<compile_context>
chip_gen: v6e
topology: v6e:2x2x1
jax: 0.10.0
libtpu: 0.0.40
codegen_flags: <defaults>
</compile_context>

<pallas_src>
import numpy as np
import jax
import jax.numpy as jnp
from jax.experimental import pallas as pl
from jax.experimental.pallas import tpu as pltpu


def _round_up(x, m):
    return (x + m - 1) // m * m


def basic_phrase_inference(feature_obj, feature_region, mat_predicate,
                           w_sub, b_sub, w_obj, b_obj, *, tp=512, tm=512):
    """Forward pass of Basic_Phrase_Inference_Structure.

    feature_obj:    (N_obj, dim_ho) f32
    feature_region: (N_reg, dim_mm) f32
    mat_predicate:  (P, 3) int  -- columns: subject idx, object idx, region idx
    w_sub / w_obj:  (dim_ho, dim_mm)   (x @ W convention)
    b_sub / b_obj:  (dim_mm,) or (1, dim_mm)
    """
    N_obj, dim_ho = feature_obj.shape
    N_reg = feature_region.shape[0]
    P = int(mat_predicate.shape[0])
    dim_mm = w_sub.shape[1]

    Np = _round_up(dim_mm, 128)          # lane-dense output width (no-op at prod sizes)

    # ---- indices (scalar-prefetched into SMEM; no wrapper-side gathers) ----
    idx_sub = jnp.asarray(mat_predicate[:, 0], jnp.int32)
    idx_obj = jnp.asarray(mat_predicate[:, 1], jnp.int32)
    idx_reg = jnp.asarray(mat_predicate[:, 2], jnp.int32)

    # ---- small parameter / table preps (N_obj / N_reg sized, never P sized) ----
    b_sum = (jnp.reshape(b_sub, (1, dim_mm)) + jnp.reshape(b_obj, (1, dim_mm))).astype(jnp.float32)
    if Np == dim_mm:
        w_cat = jnp.concatenate([w_sub, w_obj], axis=1).astype(jnp.bfloat16)   # (dim_ho, 2*Np)
        b_pad = b_sum
        reg_pad = feature_region.astype(jnp.float32)
    else:
        w_cat = jnp.zeros((dim_ho, 2 * Np), jnp.bfloat16)
        w_cat = w_cat.at[:, :dim_mm].set(w_sub.astype(jnp.bfloat16))
        w_cat = w_cat.at[:, Np:Np + dim_mm].set(w_obj.astype(jnp.bfloat16))
        b_pad = jnp.zeros((1, Np), jnp.float32).at[:, :dim_mm].set(b_sum)
        reg_pad = jnp.zeros((N_reg, Np), jnp.float32).at[:, :dim_mm].set(
            feature_region.astype(jnp.float32))

    # =====================================================================
    # Kernel 1: per-object transforms  T = relu(X) @ [W_sub | W_obj]
    # =====================================================================
    tm_eff = max(8, min(tm, _round_up(N_obj, 8)))        # multiple of 8
    grid1 = (pl.cdiv(N_obj, tm_eff),)

    def transform_kernel(x_ref, w_ref, tsub_ref, tobj_ref):
        # x_ref: (tm_eff, dim_ho) f32, w_ref: (dim_ho, 2*Np) bf16 (resident)
        x = jnp.maximum(x_ref[...], 0.0).astype(jnp.bfloat16)   # ReLU in f32, cast at MXU input
        y = jnp.dot(x, w_ref[...], preferred_element_type=jnp.float32)  # (tm_eff, 2*Np) f32
        tsub_ref[...] = y[:, :Np]
        tobj_ref[...] = y[:, Np:]

    t_sub, t_obj = pl.pallas_call(
        transform_kernel,
        out_shape=(jax.ShapeDtypeStruct((N_obj, Np), jnp.float32),
                   jax.ShapeDtypeStruct((N_obj, Np), jnp.float32)),
        grid_spec=pltpu.PrefetchScalarGridSpec(
            num_scalar_prefetch=0,
            grid=grid1,
            in_specs=[
                pl.BlockSpec((tm_eff, dim_ho), lambda i: (i, 0)),   # object-row tile
                pl.BlockSpec((dim_ho, 2 * Np), lambda i: (0, 0)),   # stacked weights (resident)
            ],
            out_specs=[
                pl.BlockSpec((tm_eff, Np), lambda i: (i, 0)),
                pl.BlockSpec((tm_eff, Np), lambda i: (i, 0)),
            ]),
        compiler_params=pltpu.CompilerParams(dimension_semantics=("parallel",)),
    )(feature_obj.astype(jnp.float32), w_cat)

    # =====================================================================
    # Kernel 2: per-predicate fuse  out[p] = T_sub[s] + T_obj[o] + reg[g] + b
    # =====================================================================
    tp_eff = max(8, min(tp, _round_up(P, 8)))             # multiple of 8
    grid2 = (pl.cdiv(P, tp_eff),)

    def fuse_kernel(idx_s_ref, idx_o_ref, idx_r_ref,       # SMEM (scalar prefetch)
                    tsub_ref, tobj_ref, reg_ref, b_ref,    # resident VMEM tables
                    out_ref):                               # (tp_eff, Np) output tile
        i = pl.program_id(0)
        base = i * tp_eff
        rows = jnp.minimum(tp_eff, P - base)                # handle partial last tile
        bias = b_ref[...]                                   # hoisted out of the loop

        def body(r, carry):
            p = base + r
            s = idx_s_ref[p]
            o = idx_o_ref[p]
            g = idx_r_ref[p]
            val = (tsub_ref[pl.ds(s, 1), :] + tobj_ref[pl.ds(o, 1), :]
                   + reg_ref[pl.ds(g, 1), :] + bias)
            out_ref[pl.ds(r, 1), :] = val
            return carry

        jax.lax.fori_loop(0, rows, body, 0)

    out_padded = pl.pallas_call(
        fuse_kernel,
        out_shape=jax.ShapeDtypeStruct((P, Np), jnp.float32),
        grid_spec=pltpu.PrefetchScalarGridSpec(
            num_scalar_prefetch=3,
            grid=grid2,
            in_specs=[
                pl.BlockSpec((N_obj, Np), lambda i, s, o, g: (0, 0)),  # T_sub (resident)
                pl.BlockSpec((N_obj, Np), lambda i, s, o, g: (0, 0)),  # T_obj (resident)
                pl.BlockSpec((N_reg, Np), lambda i, s, o, g: (0, 0)),  # region table (resident)
                pl.BlockSpec((1, Np), lambda i, s, o, g: (0, 0)),      # fused bias (resident)
            ],
            out_specs=pl.BlockSpec((tp_eff, Np), lambda i, s, o, g: (i, 0))),
        compiler_params=pltpu.CompilerParams(dimension_semantics=("parallel",)),
    )(idx_sub, idx_obj, idx_reg, t_sub, t_obj, reg_pad, b_pad)

    return out_padded if Np == dim_mm else out_padded[:, :dim_mm]


if __name__ == "__main__":
    # Small deterministic shapes consistent with the module's forward:
    #   opts = {'dim_ho': 32, 'dim_mm': 32, 'use_bias': True}
    N_obj, N_reg, P = 6, 5, 8
    dim_ho, dim_mm = 32, 32
    use_bias = True

    key = jax.random.PRNGKey(0)
    k1, k2, k3, k4, k5, k6 = jax.random.split(key, 6)

    feature_obj = jax.random.normal(k1, (N_obj, dim_ho), jnp.float32)
    feature_region = jax.random.normal(k2, (N_reg, dim_mm), jnp.float32)

    # Deterministic synthetic parameters (no checkpoint).  Stored as (dim_ho, dim_mm)
    # so the kernel computes x @ W (== torch's x @ W.T with W (dim_mm, dim_ho)).
    w_sub = jax.random.normal(k3, (dim_ho, dim_mm), jnp.float32) / np.sqrt(dim_ho)
    w_obj = jax.random.normal(k4, (dim_ho, dim_mm), jnp.float32) / np.sqrt(dim_ho)
    if use_bias:
        b_sub = 0.01 * jax.random.normal(k5, (1, dim_mm), jnp.float32)
        b_obj = 0.01 * jax.random.normal(k6, (1, dim_mm), jnp.float32)
    else:
        b_sub = jnp.zeros((1, dim_mm), jnp.float32)
        b_obj = jnp.zeros((1, dim_mm), jnp.float32)

    # mat_predicate[:, 0]=subject obj idx, [:,1]=object obj idx, [:,2]=region idx
    mat_predicate = np.stack(
        [np.arange(P) % N_obj, (np.arange(P) + 1) % N_obj, np.arange(P) % N_reg],
        axis=1,
    ).astype(np.int64)

    out = basic_phrase_inference(feature_obj, feature_region, mat_predicate,
                                 w_sub, b_sub, w_obj, b_obj)
    out = jax.block_until_ready(out)

    # Pure-JAX f32 reference (original two-branch formulation).  The kernel uses
    # bf16 MXU inputs with f32 accumulation, so the tolerance is loosened.
    i_s = mat_predicate[:, 0]
    i_o = mat_predicate[:, 1]
    i_r = mat_predicate[:, 2]
    ref = (jnp.maximum(feature_obj[i_s], 0.0) @ w_sub + b_sub
           + jnp.maximum(feature_obj[i_o], 0.0) @ w_obj + b_obj
           + feature_region[i_r])
    np.testing.assert_allclose(np.asarray(out), np.asarray(ref), rtol=2e-2, atol=2e-2)

    print("KERNEL_OK")
</pallas_src>

<mosaic_0001>
module attributes {stable_mosaic.version = 11 : i64} {
  func.func @transform_kernel(%arg0: i32, %arg1: memref<8x32xf32, #tpu.memory_space<vmem>>, %arg2: memref<32x256xbf16, #tpu.memory_space<vmem>>, %arg3: memref<8x128xf32, #tpu.memory_space<vmem>>, %arg4: memref<8x128xf32, #tpu.memory_space<vmem>>) attributes {dimension_semantics = [#tpu.dimension_semantics<parallel>], iteration_bounds = array<i64: 1>, scalar_prefetch = 0 : i64, scratch_operands = 0 : i64, tpu.core_type = #tpu.core_type<tc>, window_params = [{transform_indices = @transform_0, window_bounds = array<i64: 8, 32>}, {pipeline_mode = #tpu.pipeline_mode<synchronous>, transform_indices = @transform_1, window_bounds = array<i64: 32, 256>}, {transform_indices = @transform_2, window_bounds = array<i64: 8, 128>}, {transform_indices = @transform_3, window_bounds = array<i64: 8, 128>}]} {
    %c0 = arith.constant 0 : index
    %c0_0 = arith.constant 0 : index
    %0 = vector.load %arg1[%c0, %c0_0] : memref<8x32xf32, #tpu.memory_space<vmem>>, vector<8x32xf32>
    %cst = arith.constant 0.000000e+00 : f32
    %1 = vector.broadcast %cst : f32 to vector<8x32xf32>
    %2 = arith.maximumf %0, %1 : vector<8x32xf32>
    %3 = arith.truncf %2 : vector<8x32xf32> to vector<8x32xbf16>
    %c0_1 = arith.constant 0 : index
    %c0_2 = arith.constant 0 : index
    %4 = vector.load %arg2[%c0_1, %c0_2] : memref<32x256xbf16, #tpu.memory_space<vmem>>, vector<32x256xbf16>
    %cst_3 = arith.constant dense<0.000000e+00> : vector<8x256xf32>
    %5 = tpu.matmul %3, %4, %cst_3 {dimension_numbers = #tpu.dot_dimension_numbers<[1], [0], [0], [1], [0, 0, 1, 1], [], []>} : vector<8x32xbf16>, vector<32x256xbf16>, vector<8x256xf32> -> vector<8x256xf32>
    %6 = vector.extract_strided_slice %5 {offsets = [0, 0], sizes = [8, 128], strides = [1, 1]} : vector<8x256xf32> to vector<8x128xf32>
    %c0_4 = arith.constant 0 : index
    %c0_5 = arith.constant 0 : index
    %7 = vector.load %arg3[%c0_4, %c0_5] : memref<8x128xf32, #tpu.memory_space<vmem>>, vector<8x128xf32>
    tpu.vector_store %arg3[%c0_4, %c0_5], %6 {strides = array<i32>} : memref<8x128xf32, #tpu.memory_space<vmem>>, vector<8x128xf32>,
    %8 = vector.extract_strided_slice %5 {offsets = [0, 128], sizes = [8, 128], strides = [1, 1]} : vector<8x256xf32> to vector<8x128xf32>
    %c0_6 = arith.constant 0 : index
    %c0_7 = arith.constant 0 : index
    %9 = vector.load %arg4[%c0_6, %c0_7] : memref<8x128xf32, #tpu.memory_space<vmem>>, vector<8x128xf32>
    tpu.vector_store %arg4[%c0_6, %c0_7], %8 {strides = array<i32>} : memref<8x128xf32, #tpu.memory_space<vmem>>, vector<8x128xf32>,
    return
  }
  func.func @transform_0(%arg0: i32) -> (i32, i32) {
    %c0_i32 = arith.constant 0 : i32
    %c0_i32_0 = arith.constant 0 : i32
    return %arg0, %c0_i32 : i32, i32
  }
  func.func @transform_1(%arg0: i32) -> (i32, i32) {
    %c0_i32 = arith.constant 0 : i32
    %c0_i32_0 = arith.constant 0 : i32
    %c0_i32_1 = arith.constant 0 : i32
    return %c0_i32, %c0_i32_0 : i32, i32
  }
  func.func @transform_2(%arg0: i32) -> (i32, i32) {
    %c0_i32 = arith.constant 0 : i32
    %c0_i32_0 = arith.constant 0 : i32
    return %arg0, %c0_i32 : i32, i32
  }
  func.func @transform_3(%arg0: i32) -> (i32, i32) {
    %c0_i32 = arith.constant 0 : i32
    %c0_i32_0 = arith.constant 0 : i32
    return %arg0, %c0_i32 : i32, i32
  }
}

</mosaic_0001>

<bundles_post_ra>
// kernel: tpu_custom_call.1
= control target key start
LH: loop header
LB: loop body
LE: loop exit
PB: predicated region body
PF: predicated region fallthrough
CT: control target
= control target key end

     0   :  { %9 = vsyncpa [#allocation3], 0  ;;  %s291_s0 = inlined_call_operand.hbm [shape: f32[6,32], index: 0, kind: input, shape index: {}]   ;;  %s292_s1 = inlined_call_operand.hbm [shape: bf16[32,256], index: 1, kind: input, shape index: {}]   ;;  %s293_s2 = inlined_call_operand.hbm [shape: f32[6,128], index: 2, kind: output, shape index: {0}]   ;;  %s294_s3 = inlined_call_operand.hbm [shape: f32[6,128], index: 3, kind: output, shape index: {1}]  }
   0x1   :  { %10 = vsyncpa [#allocation6], 0 }
   0x2   :  { %11 = vsyncpa [#allocation4], 0 }
   0x3   :  { %12 = vsyncpa [#allocation9], 0  ;;  %s252_s12 = smov [#allocation2]   ;;  %s253_s14 = smov [#allocation5]  }
   0x4   :  { %s19_s13 = sshll.u32 %s252_s12, 4  ;;  %s28_s15 = sshll.u32 %s253_s14, 4  ;;  %s20_s13 = int_to_ptr.vmem [resolvable:$true] %s19_s13  ;;  %s29_s15 = int_to_ptr.vmem [resolvable:$true] %s28_s15 }
   0x5   :  { %s172_s16 = scalar_lea.vmem %s20_s13, 128  ;;  %p177_p1 = scmp.lt.s32.totalorder %s20_s13, %s20_s13 }
   0x6   :  { %p173_p0 = scmp.ne.s32.totalorder %s20_s13, %s172_s16  ;;  %p178_p2 = scmp.lt.s32.totalorder %s172_s16, %s172_s16 }
   0x8   :  { %p179_p3 = por %p178_p2, %p177_p1 }
   0xa   :  { %p180_p4 = pnand %p179_p3, %p173_p0 }
   0xc   :  { %183 = shalt.err (!%p180_p4)
}
   0xd   :  { %22 = dma.hbm_to_vmem [thread:$0]  %s291_s0, 128, %s20_s13, [#allocation3]  }
   0xe   :  { %s192_s19 = scalar_lea.vmem %s29_s15, 512  ;;  %p197_p6 = scmp.lt.s32.totalorder %s29_s15, %s29_s15 }
   0xf   :  { %p193_p5 = scmp.ne.s32.totalorder %s29_s15, %s192_s19  ;;  %p198_p7 = scmp.lt.s32.totalorder %s192_s19, %s192_s19 }
  0x11   :  { %p199_p8 = por %p198_p7, %p197_p6 }
  0x13   :  { %p200_p9 = pnand %p199_p8, %p193_p5 }
  0x15   :  { %203 = shalt.err (!%p200_p9)
}
  0x16   :  { %s254_s20 = smov 128   ;;  %s255_s21 = smov 8  }
  0x17   :  { %34 = dma.hbm_to_vmem [thread:$0]  %s292_s1, 512, %s29_s15, [#allocation6], %s254_s20, %s254_s20, %s255_s21  }
  0x18   :  { %244 = dma.done.wait [#allocation3], 128  }
  0x19   :  { %245 = vsyncadd [#allocation3], 4294967168 }
  0x1a   :  { %246 = dma.done.wait [#allocation6], 512  }
  0x1b   :  { %247 = vsyncadd [#allocation6], 4294966784  ;;  %v256_v0 = vmov 0   ;;  %v158_v1 = vld [vmem:[#allocation5 + $0x14] ss:$8 sps:$4 sm:$0xff]   ;;  %vm69_vm0 = vcmask 261120  }
  0x1c   :  { %105 = vmatprep.mubr.bf16.mxu0 %v256_v0  ;;  %v160_v2 = vld [vmem:[#allocation5 + $0x10] ss:$8 sps:$4 sm:$0xff]   ;;  %85 = vmatprep.subr.bf16.mxu0 %v158_v1  ;;  %v161_v3 = vld [vmem:[#allocation5 + $0x4] ss:$8 sps:$4 sm:$0xff]   ;;  %v163_v5 = vld [vmem:[#allocation5] ss:$8 sps:$4 sm:$0xff]  }
  0x1d   :  { %v42_v4 = vld [vmem:[#allocation2] sm:$0xff]  ;;  %86 = vmatpush1.bf16.msra.mxu0 %v160_v2  ;;  %s257_s0 = smov [#allocation7]   ;;  %s258_s24 = smov [#allocation8]  }
  0x1e   :  { %v43_v6 = vmax.f32 %v42_v4, 0.0  ;;  %87 = vmatprep.subr.bf16.mxu0 %v161_v3  ;;  %s122_s1 = sshll.u32 %s257_s0, 4  ;;  %s132_s25 = sshll.u32 %s258_s24, 4  ;;  %s123_s1 = int_to_ptr.vmem [resolvable:$true] %s122_s1  ;;  %s133_s25 = int_to_ptr.vmem [resolvable:$true] %s132_s25 }
  0x1f   :  { %s204_s26 = scalar_lea.vmem %s123_s1, 128  ;;  %p209_p11 = scmp.lt.s32.totalorder %s123_s1, %s123_s1 }
  0x20   :  { %v44_v7 = vpack.c.bf16 %v43_v6, %v43_v6  ;;  %p205_p10 = scmp.ne.s32.totalorder %s123_s1, %s204_s26  ;;  %p210_p12 = scmp.lt.s32.totalorder %s204_s26, %s204_s26 }
  0x21   :  { %88 = vmatpush1.bf16.msra.mxu0 %v163_v5 }
  0x22   :  { %p211_p13 = por %p210_p12, %p209_p11 }
  0x24   :  { %150 = vmatmul.mubr.msk.bf16.vlgmr.msra.gmra.mxu0 %vm69_vm0, %v44_v7  ;;  %p212_p0 = pnand %p211_p13, %p205_p10 }
  0xe4   :  { %v107_v8 = vpop.f32.mrf.mxu0 }
  0xe5   :  { %114 = vst [vmem:[#allocation7] sm:$0xff] %v107_v8 }
  0xe6   :  { %v109_v9 = vpop.f32.mrf.mxu0 }
  0xe7   :  { %215 = shalt.err (!%p212_p0)
}
  0xe8   :  { %125 = dma.vmem_to_hbm [thread:$0]  %s123_s1, 128, %s293_s2, [#allocation4]   ;;  %115 = vst [vmem:[#allocation8] sm:$0xff] %v109_v9  ;;  %v111_v10 = vpop.f32.mrf.mxu0 }
  0xe9   :  { %s224_s29 = scalar_lea.vmem %s133_s25, 128  ;;  %p229_p2 = scmp.lt.s32.totalorder %s133_s25, %s133_s25 }
  0xea   :  { %p225_p1 = scmp.ne.s32.totalorder %s133_s25, %s224_s29  ;;  %p230_p3 = scmp.lt.s32.totalorder %s224_s29, %s224_s29 }
  0xec   :  { %p231_p4 = por %p230_p3, %p229_p2 }
  0xee   :  { %p232_p5 = pnand %p231_p4, %p225_p1 }
  0xf0   :  { %235 = shalt.err (!%p232_p5)
}
  0xf1   :  { %135 = dma.vmem_to_hbm [thread:$0]  %s133_s25, 128, %s294_s3, [#allocation9]   ;;  %v112_v11 = vpop.f32.mrf.mxu0 }
  0xf2   :  { %248 = dma.done.wait [#allocation4], 128  }
  0xf3   :  { %249 = vsyncadd [#allocation4], 4294967168 }
  0xf4   :  { %250 = dma.done.wait [#allocation9], 128  }
  0xf5   :  { %251 = vsyncadd [#allocation9], 4294967168 }
  0xf6   :  { %142 = vsyncpa [#allocation3], 1 }
  0xf7   :  { %143 = vsyncpa [#allocation6], 1 }
  0xf8   :  { %144 = vsyncpa [#allocation4], 1 }
  0xf9   :  { %145 = vsyncpa [#allocation9], 1 }

</bundles_post_ra>
